<compile_context>
chip_gen: v7x
topology: tpu7x:2x2x1
jax: 0.10.0
libtpu: 0.0.40
codegen_flags: <defaults>
</compile_context>

<pallas_src>
import functools

import jax
import jax.numpy as jnp
from jax.experimental import pallas as pl
from jax.experimental.pallas import tpu as pltpu


def _round_up(x, m):
    return ((x + m - 1) // m) * m


def _sublane(itemsize):
    # Sublane tile height by element size: f32 -> 8, bf16 -> 16, int8/fp8 -> 32.
    return {4: 8, 2: 16, 1: 32}.get(int(itemsize), 8)


def _vmem_tile_bytes(shape, itemsize):
    """Approx. bytes one VMEM buffer occupies for a block of `shape` (tile-padded)."""
    itemsize = int(itemsize)
    if len(shape) < 2:
        return _sublane(itemsize) * _round_up(int(shape[0]), 128) * itemsize
    lead = 1
    for d in shape[:-2]:
        lead *= int(d)
    return (lead * _round_up(int(shape[-2]), _sublane(itemsize))
            * _round_up(int(shape[-1]), 128) * itemsize)


def _tpu_vmem_capacity_bytes():
    try:
        return int(pltpu.get_tpu_info().vmem_capacity_bytes)
    except Exception:
        return 64 << 20  # conservative fallback (v7x-sized VMEM)


def _machine_budget(physical):
    # Usable VMEM per kernel: ~112 MiB on v5e/v6e (128 MiB physical), ~48 MiB on
    # v7x (64 MiB physical).  Bigger budget => the fused single-pass path stays
    # viable for larger (C, HW) slabs where the extra pass over x costs most.
    return max(32 << 20, min(physical - (16 << 20), physical * 7 // 8))


def _vmem_limit(est_bytes, machine_cap):
    # Floor at the 32 MiB default scoped limit, cap at the generation-aware budget.
    return int(min(max(est_bytes + (4 << 20), 32 << 20), machine_cap))


# ----------------------------------------------------------------------------
# Path A: fused single-pass kernel (one HBM read + one HBM write of x).
# ----------------------------------------------------------------------------
def _fused_kernel(x_ref, w1_ref, b1c_ref, w2_ref, b2c_ref, o_ref, *, inv_hw):
    # x block: (1, C, HW) full extent -> the sum below is over the true HW.
    xb = x_ref[0]                                                          # (C, HW)
    pooled = jnp.sum(xb, axis=-1, keepdims=True, dtype=jnp.float32) * inv_hw   # (C, 1)

    # fc1 (C -> hidden) + ReLU, fc2 (hidden -> C) + sigmoid (torch.nn.Linear layout).
    h = jnp.dot(w1_ref[...], pooled, preferred_element_type=jnp.float32)
    h = jnp.maximum(h + b1c_ref[...], 0.0)                                 # (hidden, 1)
    g = jnp.dot(w2_ref[...], h, preferred_element_type=jnp.float32)
    g = jax.nn.sigmoid(g + b2c_ref[...])                                   # (C, 1)

    o_ref[0] = (xb * g).astype(o_ref.dtype)


# ----------------------------------------------------------------------------
# Path B: pooling reduction kernel + elementwise rescale kernel.
# (fc1/ReLU/fc2/sigmoid run in plain XLA on the tiny pooled (B, C) array.)
# ----------------------------------------------------------------------------
def _pool_kernel(x_ref, sum_ref, *, true_hw, hw_tile, needs_mask):
    t = pl.program_id(1)

    @pl.when(t == 0)
    def _init():
        sum_ref[...] = jnp.zeros_like(sum_ref)

    xb = x_ref[0]                                                          # (C, tile)
    if needs_mask:
        # Partial last tile: out-of-bounds lane contents are unspecified -> mask.
        lane = jax.lax.broadcasted_iota(jnp.int32, xb.shape, 1) + t * hw_tile
        xb = jnp.where(lane < true_hw, xb, jnp.zeros_like(xb))
    sum_ref[0] += jnp.sum(xb, axis=-1, keepdims=True, dtype=jnp.float32)   # (C, 1)


def _rescale_kernel(x_ref, gate_ref, o_ref):
    # Pure elementwise: x block (1, C, tile) * per-channel gate column (1, C, 1).
    o_ref[0] = (x_ref[0] * gate_ref[0]).astype(o_ref.dtype)


# ----------------------------------------------------------------------------
# Wrapper
# ----------------------------------------------------------------------------
def channel_attention(x_nchw, w1, b1, w2, b2, *, vmem_budget_bytes=None):
    """SE-style ChannelAttention forward.

    x_nchw: (B, C, H, W).  Weights follow torch.nn.Linear layout:
      w1: (C//16, C), b1: (C//16,), w2: (C, C//16), b2: (C,).
    vmem_budget_bytes: optional override of the auto (generation-aware) budget,
      used only for the path / tile decisions (compiler limit stays clamped to
      safe machine bounds).
    """
    B, C, H, W = x_nchw.shape
    hidden = w1.shape[0]
    HW = H * W
    isz = jnp.dtype(x_nchw.dtype).itemsize
    inv_hw = 1.0 / float(HW)

    physical = _tpu_vmem_capacity_bytes()
    machine_cap = _machine_budget(physical)
    budget = machine_cap if vmem_budget_bytes is None else int(vmem_budget_bytes)

    # Parameter VMEM footprint of the fused path (double-buffered by the pipeline).
    wbytes = (_vmem_tile_bytes((hidden, C), 4) + _vmem_tile_bytes((C, hidden), 4)
              + _vmem_tile_bytes((hidden, 1), 4) + _vmem_tile_bytes((C, 1), 4))

    x_flat = x_nchw.reshape(B, C, HW)

    # Pre-compute the rescale tile cap (also used for the small-B v7x decision).
    Cr = _round_up(C, _sublane(isz))
    avail = max(budget - (1 << 20), 0)
    r_cap = max(128, ((avail // 5) // (Cr * isz)) // 128 * 128)

    # --- path choice --------------------------------------------------------
    est_fused = 4 * _vmem_tile_bytes((1, C, HW), isz) + 2 * wbytes
    use_fused = est_fused + (2 << 20) <= budget

    small_vmem_chip = physical <= (64 << 20)          # v7x-like: 64 MiB VMEM, 2 TCs
    if small_vmem_chip and B == 1 and HW > r_cap:
        # grid=(1,) would leave one TensorCore idle; the two-pass (B, hw_tiles)
        # grids shard across both cores, which outweighs the extra HBM pass here.
        use_fused = False

    if use_fused:
        b1c = jnp.asarray(b1, jnp.float32).reshape(hidden, 1)
        b2c = jnp.asarray(b2, jnp.float32).reshape(C, 1)
        cost = pl.CostEstimate(
            flops=int(B * (2 * C * HW + 4 * C * hidden)),
            transcendentals=int(B * C),
            bytes_accessed=int(2 * B * C * HW * isz + (2 * C * hidden + C + hidden) * 4),
        )
        out_flat = pl.pallas_call(
            functools.partial(_fused_kernel, inv_hw=inv_hw),
            out_shape=jax.ShapeDtypeStruct((B, C, HW), x_nchw.dtype),
            grid_spec=pltpu.PrefetchScalarGridSpec(
                num_scalar_prefetch=0,
                grid=(B,),
                in_specs=[
                    pl.BlockSpec((1, C, HW), lambda b: (b, 0, 0)),
                    pl.BlockSpec((hidden, C), lambda b: (0, 0)),
                    pl.BlockSpec((hidden, 1), lambda b: (0, 0)),
                    pl.BlockSpec((C, hidden), lambda b: (0, 0)),
                    pl.BlockSpec((C, 1), lambda b: (0, 0)),
                ],
                out_specs=pl.BlockSpec((1, C, HW), lambda b: (b, 0, 0)),
            ),
            compiler_params=pltpu.CompilerParams(
                dimension_semantics=("parallel",),
                vmem_limit_bytes=_vmem_limit(est_fused, machine_cap),
            ),
            cost_estimate=cost,
        )(x_flat, jnp.asarray(w1), b1c, jnp.asarray(w2), b2c)
    else:
        # ---- Pass 1: pooled sums (pure reduction, no resident parameters). ----
        g_cap = max(128, ((avail // 3) // (Cr * isz)) // 128 * 128)
        if HW <= g_cap:
            gtile, g_steps, needs_mask = HW, 1, False        # full-extent block
        else:
            gtile = g_cap                                     # multiple of 128
            g_steps = pl.cdiv(HW, gtile)
            needs_mask = (HW % gtile) != 0

        est_pool = (3 * _vmem_tile_bytes((1, C, gtile), isz)
                    + 2 * _vmem_tile_bytes((1, C, 1), 4))
        pool_cost = pl.CostEstimate(
            flops=int(B * C * HW),
            transcendentals=0,
            bytes_accessed=int(B * C * HW * isz + B * C * 4),
        )
        pooled_sum = pl.pallas_call(
            functools.partial(_pool_kernel, true_hw=HW, hw_tile=gtile,
                              needs_mask=needs_mask),
            out_shape=jax.ShapeDtypeStruct((B, C, 1), jnp.float32),
            grid_spec=pltpu.PrefetchScalarGridSpec(
                num_scalar_prefetch=0,
                grid=(B, g_steps),
                in_specs=[pl.BlockSpec((1, C, gtile), lambda b, t: (b, 0, t))],
                out_specs=pl.BlockSpec((1, C, 1), lambda b, t: (b, 0, 0)),
            ),
            compiler_params=pltpu.CompilerParams(
                dimension_semantics=("parallel", "arbitrary"),
                vmem_limit_bytes=_vmem_limit(est_pool, machine_cap),
            ),
            cost_estimate=pool_cost,
        )(x_flat)

        # Tiny (B, C) gating chain in plain XLA (negligible vs the streaming passes).
        pooled = pooled_sum.reshape(B, C) * inv_hw
        h = jnp.maximum(pooled @ jnp.asarray(w1, jnp.float32).T
                        + jnp.asarray(b1, jnp.float32), 0.0)
        gate = jax.nn.sigmoid(h @ jnp.asarray(w2, jnp.float32).T
                              + jnp.asarray(b2, jnp.float32))
        gate_col = gate.reshape(B, C, 1)

        # ---- Pass 2: elementwise rescale, own (large) spatial tile. ----
        if HW <= r_cap:
            rtile, r_steps = HW, 1
        else:
            rtile, r_steps = r_cap, pl.cdiv(HW, r_cap)

        est_resc = (4 * _vmem_tile_bytes((1, C, rtile), isz)
                    + 2 * _vmem_tile_bytes((1, C, 1), 4))
        resc_cost = pl.CostEstimate(
            flops=int(B * C * HW),
            transcendentals=0,
            bytes_accessed=int(2 * B * C * HW * isz + B * C * 4),
        )
        out_flat = pl.pallas_call(
            _rescale_kernel,
            out_shape=jax.ShapeDtypeStruct((B, C, HW), x_nchw.dtype),
            grid_spec=pltpu.PrefetchScalarGridSpec(
                num_scalar_prefetch=0,
                grid=(B, r_steps),
                in_specs=[
                    pl.BlockSpec((1, C, rtile), lambda b, t: (b, 0, t)),
                    pl.BlockSpec((1, C, 1), lambda b, t: (b, 0, 0)),
                ],
                out_specs=pl.BlockSpec((1, C, rtile), lambda b, t: (b, 0, t)),
            ),
            compiler_params=pltpu.CompilerParams(
                dimension_semantics=("parallel", "parallel"),
                vmem_limit_bytes=_vmem_limit(est_resc, machine_cap),
            ),
            cost_estimate=resc_cost,
        )(x_flat, gate_col)

    return out_flat.reshape(B, C, H, W)


def reference(x_nchw, w1, b1, w2, b2):
    # Pure-JAX reference mirroring the PyTorch forward.
    y = jnp.mean(x_nchw, axis=(2, 3))                       # (B, C)
    y = jnp.maximum(y @ w1.T + b1, 0.0)
    y = jax.nn.sigmoid(y @ w2.T + b2)
    return x_nchw * y[:, :, None, None]


def _run_case(B, C, H, W, **kwargs):
    hidden = C // 16
    key = jax.random.PRNGKey(0)
    kx, k1, k2, k3, k4 = jax.random.split(key, 5)
    x = jax.random.normal(kx, (B, C, H, W), dtype=jnp.float32)
    w1 = jax.random.normal(k1, (hidden, C), dtype=jnp.float32) * 0.1
    b1 = jax.random.normal(k2, (hidden,), dtype=jnp.float32) * 0.1
    w2 = jax.random.normal(k3, (C, hidden), dtype=jnp.float32) * 0.1
    b2 = jax.random.normal(k4, (C,), dtype=jnp.float32) * 0.1

    out = jax.block_until_ready(channel_attention(x, w1, b1, w2, b2, **kwargs))
    ref = reference(x, w1, b1, w2, b2)
    assert out.shape == x.shape
    assert jnp.allclose(out, ref, atol=1e-5, rtol=1e-5), (
        f"mismatch vs reference for shape {(B, C, H, W)} kwargs={kwargs}")


if __name__ == "__main__":
    # 1) Fused single-pass path (slab fits the generation-aware VMEM budget).
    _run_case(2, 64, 16, 16)
    # 2) Force the two-pass path (pool reduction + XLA gate + parallel rescale)
    #    with a tiny budget override — the path large feature maps take.
    _run_case(2, 64, 16, 16, vmem_budget_bytes=256 * 1024)
    # 3) Non-128-multiple spatial size (7x7) on the fused path: full-extent block,
    #    no wrapper padding, masked stores.
    _run_case(2, 32, 7, 7)
    # 4) Two-pass path with a ragged last spatial tile (HW=200, tile=128) to
    #    exercise the in-kernel iota mask and the partial boundary block.
    _run_case(2, 64, 10, 20, vmem_budget_bytes=256 * 1024)
    print("KERNEL_OK")
</pallas_src>

<mosaic_0001>
module attributes {stable_mosaic.version = 11 : i64} {
  func.func @_fused_kernel(%arg0: i32, %arg1: memref<1x64x256xf32, #tpu.memory_space<vmem>>, %arg2: memref<4x64xf32, #tpu.memory_space<vmem>>, %arg3: memref<4x1xf32, #tpu.memory_space<vmem>>, %arg4: memref<64x4xf32, #tpu.memory_space<vmem>>, %arg5: memref<64x1xf32, #tpu.memory_space<vmem>>, %arg6: memref<1x64x256xf32, #tpu.memory_space<vmem>>) attributes {dimension_semantics = [#tpu.dimension_semantics<parallel>], iteration_bounds = array<i64: 2>, scalar_prefetch = 0 : i64, scratch_operands = 0 : i64, tpu.core_type = #tpu.core_type<tc>, window_params = [{transform_indices = @transform_0, window_bounds = array<i64: 1, 64, 256>}, {pipeline_mode = #tpu.pipeline_mode<synchronous>, transform_indices = @transform_1, window_bounds = array<i64: 4, 64>}, {pipeline_mode = #tpu.pipeline_mode<synchronous>, transform_indices = @transform_2, window_bounds = array<i64: 4, 1>}, {pipeline_mode = #tpu.pipeline_mode<synchronous>, transform_indices = @transform_3, window_bounds = array<i64: 64, 4>}, {pipeline_mode = #tpu.pipeline_mode<synchronous>, transform_indices = @transform_4, window_bounds = array<i64: 64, 1>}, {transform_indices = @transform_5, window_bounds = array<i64: 1, 64, 256>}]} {
    %c0 = arith.constant 0 : index
    %c0_0 = arith.constant 0 : index
    %c0_1 = arith.constant 0 : index
    %0 = vector.load %arg1[%c0, %c0_0, %c0_1] : memref<1x64x256xf32, #tpu.memory_space<vmem>>, vector<1x64x256xf32>
    %1 = vector.shape_cast %0 : vector<1x64x256xf32> to vector<64x256xf32>
    %cst = arith.constant dense<0.000000e+00> : vector<64xf32>
    %2 = vector.multi_reduction <add>, %1, %cst [1] : vector<64x256xf32> to vector<64xf32>
    %3 = vector.shape_cast %2 : vector<64xf32> to vector<64x1xf32>
    %cst_2 = arith.constant 3.906250e-03 : f32
    %4 = vector.broadcast %cst_2 : f32 to vector<64x1xf32>
    %5 = arith.mulf %3, %4 : vector<64x1xf32>
    %c0_3 = arith.constant 0 : index
    %c0_4 = arith.constant 0 : index
    %6 = vector.load %arg2[%c0_3, %c0_4] : memref<4x64xf32, #tpu.memory_space<vmem>>, vector<4x64xf32>
    %cst_5 = arith.constant dense<0.000000e+00> : vector<4x1xf32>
    %7 = tpu.matmul %6, %5, %cst_5 {dimension_numbers = #tpu.dot_dimension_numbers<[1], [0], [0], [1], [0, 0, 1, 1], [], []>} : vector<4x64xf32>, vector<64x1xf32>, vector<4x1xf32> -> vector<4x1xf32>
    %c0_6 = arith.constant 0 : index
    %c0_7 = arith.constant 0 : index
    %8 = vector.load %arg3[%c0_6, %c0_7] : memref<4x1xf32, #tpu.memory_space<vmem>>, vector<4x1xf32>
    %9 = arith.addf %7, %8 : vector<4x1xf32>
    %cst_8 = arith.constant 0.000000e+00 : f32
    %10 = vector.broadcast %cst_8 : f32 to vector<4x1xf32>
    %11 = arith.maximumf %9, %10 : vector<4x1xf32>
    %c0_9 = arith.constant 0 : index
    %c0_10 = arith.constant 0 : index
    %12 = vector.load %arg4[%c0_9, %c0_10] : memref<64x4xf32, #tpu.memory_space<vmem>>, vector<64x4xf32>
    %cst_11 = arith.constant dense<0.000000e+00> : vector<64x1xf32>
    %13 = tpu.matmul %12, %11, %cst_11 {dimension_numbers = #tpu.dot_dimension_numbers<[1], [0], [0], [1], [0, 0, 1, 1], [], []>} : vector<64x4xf32>, vector<4x1xf32>, vector<64x1xf32> -> vector<64x1xf32>
    %c0_12 = arith.constant 0 : index
    %c0_13 = arith.constant 0 : index
    %14 = vector.load %arg5[%c0_12, %c0_13] : memref<64x1xf32, #tpu.memory_space<vmem>>, vector<64x1xf32>
    %15 = arith.addf %13, %14 : vector<64x1xf32>
    %16 = arith.negf %15 : vector<64x1xf32>
    %17 = math.exp %16 : vector<64x1xf32>
    %cst_14 = arith.constant 1.000000e+00 : f32
    %18 = vector.broadcast %cst_14 : f32 to vector<64x1xf32>
    %19 = arith.addf %18, %17 : vector<64x1xf32>
    %20 = arith.divf %18, %19 : vector<64x1xf32>
    %21 = vector.broadcast %20 : vector<64x1xf32> to vector<64x256xf32>
    %22 = arith.mulf %1, %21 : vector<64x256xf32>
    %c0_15 = arith.constant 0 : index
    %c0_16 = arith.constant 0 : index
    %c0_17 = arith.constant 0 : index
    %23 = vector.load %arg6[%c0_15, %c0_16, %c0_17] : memref<1x64x256xf32, #tpu.memory_space<vmem>>, vector<1x64x256xf32>
    %24 = vector.shape_cast %23 : vector<1x64x256xf32> to vector<64x256xf32>
    %25 = vector.shape_cast %22 : vector<64x256xf32> to vector<1x64x256xf32>
    tpu.vector_store %arg6[%c0_15, %c0_16, %c0_17], %25 {strides = array<i32>} : memref<1x64x256xf32, #tpu.memory_space<vmem>>, vector<1x64x256xf32>,
    return
  }
  func.func @transform_0(%arg0: i32) -> (i32, i32, i32) {
    %c0_i32 = arith.constant 0 : i32
    %c0_i32_0 = arith.constant 0 : i32
    %c0_i32_1 = arith.constant 0 : i32
    return %arg0, %c0_i32, %c0_i32_0 : i32, i32, i32
  }
  func.func @transform_1(%arg0: i32) -> (i32, i32) {
    %c0_i32 = arith.constant 0 : i32
    %c0_i32_0 = arith.constant 0 : i32
    %c0_i32_1 = arith.constant 0 : i32
    return %c0_i32, %c0_i32_0 : i32, i32
  }
  func.func @transform_2(%arg0: i32) -> (i32, i32) {
    %c0_i32 = arith.constant 0 : i32
    %c0_i32_0 = arith.constant 0 : i32
    %c0_i32_1 = arith.constant 0 : i32
    return %c0_i32, %c0_i32_0 : i32, i32
  }
  func.func @transform_3(%arg0: i32) -> (i32, i32) {
    %c0_i32 = arith.constant 0 : i32
    %c0_i32_0 = arith.constant 0 : i32
    %c0_i32_1 = arith.constant 0 : i32
    return %c0_i32, %c0_i32_0 : i32, i32
  }
  func.func @transform_4(%arg0: i32) -> (i32, i32) {
    %c0_i32 = arith.constant 0 : i32
    %c0_i32_0 = arith.constant 0 : i32
    %c0_i32_1 = arith.constant 0 : i32
    return %c0_i32, %c0_i32_0 : i32, i32
  }
  func.func @transform_5(%arg0: i32) -> (i32, i32, i32) {
    %c0_i32 = arith.constant 0 : i32
    %c0_i32_0 = arith.constant 0 : i32
    %c0_i32_1 = arith.constant 0 : i32
    return %arg0, %c0_i32, %c0_i32_0 : i32, i32, i32
  }
}

</mosaic_0001>

<bundles_post_ra>
// kernel: tpu_custom_call.1
= control target key start
LH: loop header
LB: loop body
LE: loop exit
PB: predicated region body
PF: predicated region fallthrough
CT: control target
= control target key end

     0   :  { %10 = vsyncpa [#allocation3], 0  ;;  %s1359_s0 = inlined_call_operand.hbm [shape: f32[2,64,256], index: 0, kind: input, shape index: {}]   ;;  %s1360_s1 = inlined_call_operand.vmem [shape: f32[4,64], index: 1, kind: input, shape index: {}]   ;;  %s1361_s2 = inlined_call_operand.vmem [shape: f32[4,1], index: 2, kind: input, shape index: {}]   ;;  %s1362_s3 = inlined_call_operand.vmem [shape: f32[64,4], index: 3, kind: input, shape index: {}]   ;;  %s1363_s4 = inlined_call_operand.vmem [shape: f32[64,1], index: 4, kind: input, shape index: {}]   ;;  %s1364_s5 = inlined_call_operand.hbm [shape: f32[2,64,256], index: 5, kind: output, shape index: {}]  }
   0x1   :  { %12 = vsyncpa [#allocation3 + $0x1], 0 }
   0x2   :  { %13 = vsyncpa [#allocation4], 0 }
   0x3   :  { %15 = vsyncpa [#allocation4 + $0x1], 0  ;;  %s1048_s18 = smov 0   ;;  %s1050_s19 = smov 0  }
   0x4   :  { %s1052_s20 = smov 0   ;;  %s1054_s21 = smov 0  }
   0x5 LB: > { %s1069_s22 = sadd.s32 4294967295, %s1006_s21   ;;  %s725_s23 = sadd.s32 4294967294, %s1006_s21   ;;  %s1006_s21 = sphi %s1054_s21, %s1377_s21   ;;  %s1002_s20 = sphi %s1052_s20, %s1376_s20   ;;  %s998_s19 = sphi %s1050_s19, %s1375_s19   ;;  %s994_s18 = sphi %s1048_s18, %s1374_s18  }
   0x6   : > { %s1073_s24 = sadd.s32 1, %s1006_s21   ;;  %s28_s25 = sadd.s32 1, %s1002_s20 }
   0x7   : > { %s25_s26 = ssub.s32 %s1006_s21, %s1073_s24  ;;  %p35_p0 = scmp.ne.s32.totalorder %s1002_s20, %s998_s19 }
   0x8   : > { %p26_p1 = scmp.eq.s32.totalorder %s25_s26, 0  ;;  %p36_p2 = scmp.eq.s32.totalorder %s1006_s21, 0 }
   0x9   : > { %p41_p3 = scmp.ne.s32.totalorder %s998_s19, %s994_s18  ;;  %p42_p4 = scmp.eq.s32.totalorder %s1069_s22, 0 }
   0xa   : > { %s1085_s27 = scalar_select %p26_p1, %s1002_s20, %s28_s25  }
   0xb   : > { %p1087_p5 = por %p36_p2, %p35_p0  ;;  %p1091_p6 = por %p42_p4, %p41_p3 }
   0xc   : > { %p149_p7 = scmp.eq.s32.totalorder %s1069_s22, 1  ;;  %p155_p8 = scmp.eq.s32.totalorder %s725_s23, 1 }
   0xd   : > { %p834_p10 = scmp.lt.s32.totalorder %s1006_s21, 2  ;;  %s187_s7 = sand.u32 1, %s1002_s20  }
   0xe   : > { %p1098_p11 = por %p149_p7, %p35_p0  ;;  %p1102_p12 = por %p155_p8, %p41_p3 }
   0xf   : > { %s757_s8 = sshll.u32 %s1006_s21, 11  ;;  %s728_s9 = sshll.u32 %s187_s7, 7 }
  0x10   : > { %s1368_s30 = scalar_select %p1098_p11, 1, 0 }
  0x11   : > { %s1369_s6 = scalar_select %p1102_p12, 1, 0 }
  0x12   : > { %s1111_s12 = scalar_lea.hbm %s1359_s0, %s757_s8  ;;  %s191_s13 = scalar_lea.vmem [#allocation2], %s728_s9 }
  0x13   : > { %s198_s14 = sshll.u32 %s191_s13, 4  ;;  %p1115_p13 = pnand %p834_p10, %p1087_p5  ;;  %s1119_s14 = int_to_ptr.vmem [resolvable:$true] %s198_s14 }
  0x14   : > { %s1121_s16 = scalar_lea.sflag [#allocation3], %s187_s7  ;;  %s910_s17 = scalar_lea.hbm %s1111_s12, 2048 }
  0x15   : > { %p911_p0 = scmp.ne.s32.totalorder %s1111_s12, %s910_s17  ;;  %p912_p1 = pneg %p1115_p13 }
  0x16   : > { %s915_s26 = scalar_lea.hbm %s1359_s0, 4096  ;;  %p916_p4 = scmp.lt.u32.totalorder %s1111_s12, %s1359_s0 }
  0x17   : > { %p913_p2 = pnand %p912_p1, %p911_p0  ;;  %p917_p5 = scmp.lt.u32.totalorder %s915_s26, %s910_s17 }
  0x18   : > { %p919_p8 = scmp.lt.u32.totalorder %s910_s17, %s1111_s12 }
  0x19   : > { %p914_p3 = pneg %p913_p2  ;;  %p918_p7 = por %p917_p5, %p916_p4 }
  0x1b   : > { %p920_p10 = por %p919_p8, %p918_p7 }
  0x1d   : > { %p921_p9 = pnand %p920_p10, %p914_p3 }
  0x1f   : > { %924 = shalt.err (!%p921_p9)
}
  0x20   : > { %s925_s7 = scalar_lea.vmem %s1119_s14, 2048  ;;  %s1008_s9 = smov [#allocation2]  }
  0x21   : > { %p926_p0 = scmp.ne.s32.totalorder %s1119_s14, %s925_s7  ;;  %s930_s10 = sshll.u32 %s1008_s9, 4  ;;  %s931_s10 = int_to_ptr.vmem [resolvable:$false] %s930_s10 }
  0x22   : > { %s932_s11 = scalar_lea.vmem %s931_s10, 4096  ;;  %p933_p11 = scmp.lt.s32.totalorder %s1119_s14, %s931_s10 }
  0x23   : > { %p928_p2 = pnand %p926_p0, %p912_p1  ;;  %p934_p4 = scmp.lt.s32.totalorder %s932_s11, %s925_s7 }
  0x25   : > { %p929_p12 = pneg %p928_p2  ;;  %p935_p5 = por %p934_p4, %p933_p11 }
  0x27   : > { %p936_p7 = pnand %p935_p5, %p929_p12 }
  0x29   : > { %939 = shalt.err (!%p936_p7)
}
  0x2a   : > { %s1009_s13 = smov 256   ;;  %s1010_s17 = smov 16  }
  0x2b   : > { %829 = dma.hbm_to_vmem [thread:$0]  (!%p1115_p13), %s1111_s12, 2048, %s1119_s14, %s1121_s16, %s1009_s13, %s1009_s13, %s1010_s17  }
  0x2c   : > { %p731_p9 = scmp.ge.s32.totalorder %s1006_s21, 1  ;;  %p206_p1 = scmp.lt.s32.totalorder %s1006_s21, 3 }
  0x2e   : > { %p207_p3 = pnand %p731_p9, %p206_p1 }
  0x2f   : > { %s1152_s23 = sand.u32 (!%p207_p3), 1, %s998_s19  }
  0x30   : > { %210 = sbr.rel (%p207_p3) target bundleno = 852 (0x354), region = 40  ;;  %s732_s25 = sshll.u32 (!%p207_p3), %s1152_s23, 7 }
  0x31   : > { %s213_s26 = scalar_lea.sflag (!%p207_p3), [#allocation3], %s1152_s23  ;;  %s216_s28 = scalar_lea.vmem (!%p207_p3), [#allocation2], %s732_s25 }
  0x37   : > { %985 = dma.done.wait (%p1091_p6), %s213_s26, 2048  }
  0x38   : > { %987 = vsyncadd (%p1091_p6), %s213_s26, 4294965248  ;;  %v1162_v0 = vld [vmem:[%s216_s28 + $0x20] sm:$0xff]  ;;  %v1164_v1 = vld [vmem:[%s216_s28 + $0x28] sm:$0xff]  ;;  %v1011_v24 = vmov 0.0|0.0   ;;  %vm1012_vm0 = vmmov 0   ;;  %v1013_v25 = vmov 0.0  }
  0x39   : > { %v1166_v2 = vld [vmem:[%s216_s28] sm:$0xff]  ;;  %v265_v3 = vadd.f32 %v1164_v1, %v1162_v0  ;;  %v1170_v4 = vld [vmem:[%s216_s28 + $0x8] sm:$0xff]  ;;  %v1172_v5 = vld [vmem:[%s216_s28 + $0x30] sm:$0xff]  ;;  %810 = vmatprep.subr.bf16.mxu0 %v1011_v24  ;;  %793 = vmatprep.mubr.msk.f32.mxu0 %vm1012_vm0, %v1013_v25  ;;  %vm293_vm1 = vcmask 523264   ;;  %vm384_vm2 = vcmask 31744   ;;  %vm409_vm3 = vcmask 1043456  }
  0x3a   : > { %v1174_v6 = vld [vmem:[%s216_s28 + $0x38] sm:$0xff]  ;;  %v259_v7 = vadd.f32 %v1170_v4, %v1166_v2  ;;  %v1178_v8 = vld [vmem:[%s216_s28 + $0x10] sm:$0xff]  ;;  %v1190_v14 = vld [vmem:[%s216_s28 + $0x40] sm:$0xff]  ;;  %v1014_v60 = vmov 0   ;;  %s1278_s10 = scalar_lea.vmem [#allocation5], %s732_s25  ;;  %s758_s25 = sshll.u32 %s1069_s22, 11 }
  0x3b   : > { %v1180_v9 = vld [vmem:[%s216_s28 + $0x18] sm:$0xff]  ;;  %266 = vadd.xlane.f32.xlu1 %v265_v3  ;;  %v268_v10 = vadd.f32 %v1174_v6, %v1172_v5  ;;  %v1186_v12 = vld [vmem:[%s216_s28 + $0x50] sm:$0xff]  ;;  %v1192_v15 = vld [vmem:[%s216_s28 + $0x48] sm:$0xff]  ;;  %876 = vset.pattern.permute.xlu0 %v1014_v60  ;;  %s652_s11 = sshll.u32 %s1278_s10, 4  ;;  %s1309_s26 = scalar_lea.hbm %s1364_s5, %s758_s25  ;;  %s1311_s11 = int_to_ptr.vmem [resolvable:$true] %s652_s11 }
  0x3c   : > { %260 = vadd.xlane.f32.xlu0 %v259_v7  ;;  %v262_v11 = vadd.f32 %v1180_v9, %v1178_v8  ;;  %v1188_v13 = vld [vmem:[%s216_s28 + $0x58] sm:$0xff]  ;;  %v271_v17 = vadd.f32 %v1192_v15, %v1190_v14  ;;  %v1198_v18 = vld [vmem:[%s216_s28 + $0x70] sm:$0xff]  ;;  %v1202_v20 = vld [vmem:[%s216_s28 + $0x60] sm:$0xff]  ;;  %877 = vset.pattern.permute.xlu1 %v1014_v60  ;;  %s639_s22 = scalar_lea.sflag [#allocation4], %s1152_s23  ;;  %p1371_p11 = scmp.ne.s32.totalorder %s1368_s30, 0 }
  0x3d   : > { %v274_v16 = vadd.f32 %v1188_v13, %v1186_v12  ;;  %v1200_v19 = vld [vmem:[%s216_s28 + $0x78] sm:$0xff]  ;;  %v1204_v21 = vld [vmem:[%s216_s28 + $0x68] sm:$0xff]  ;;  %v291_v46 = vld [vmem:[%s1360_s1] sm:$0xf]  ;;  %s940_s28 = scalar_lea.vmem %s1311_s11, 2048  ;;  %s1015_s29 = smov [#allocation5]  }
  0x3e   : > { %v280_v22 = vadd.f32 %v1200_v19, %v1198_v18  ;;  %v277_v23 = vadd.f32 %v1204_v21, %v1202_v20  ;;  %v368_v47 = vld [vmem:[%s1362_s3] sm:$0xff]  ;;  %v369_v53 = vld [vmem:[%s1362_s3 + $0x8] sm:$0xff]  ;;  %v370_v54 = vld [vmem:[%s1362_s3 + $0x10] sm:$0xff]  ;;  %p941_p6 = scmp.ne.s32.totalorder %s1311_s11, %s940_s28  ;;  %s944_s12 = sshll.u32 %s1015_s29, 4  ;;  %s945_s12 = int_to_ptr.vmem [resolvable:$false] %s944_s12 }
  0x3f   : > { %269 = vadd.xlane.f32.xlu1 %v268_v10  ;;  %798 = vmatprep.mubr.msk.f32.mxu1 %vm384_vm2, %v368_v47  ;;  %v292_v48 = vld [vmem:[%s1361_s2] sm:$0xf]  ;;  %v371_v55 = vld [vmem:[%s1362_s3 + $0x18] sm:$0xff]  ;;  %v373_v57 = vld [vmem:[%s1362_s3 + $0x28] sm:$0xff]  ;;  %s946_s14 = scalar_lea.vmem %s945_s12, 4096  ;;  %p947_p8 = scmp.lt.s32.totalorder %s1311_s11, %s945_s12 }
  0x40   : > { %263 = vadd.xlane.f32.xlu0 %v262_v11  ;;  %v372_v56 = vld [vmem:[%s1362_s3 + $0x20] sm:$0xff]  ;;  %v374_v58 = vld [vmem:[%s1362_s3 + $0x30] sm:$0xff]  ;;  %v375_v59 = vld [vmem:[%s1362_s3 + $0x38] sm:$0xff]  ;;  %p942_p12 = pnand %p941_p6, %p1371_p11  ;;  %p948_p10 = scmp.lt.s32.totalorder %s946_s14, %s940_s28 }
  0x41   : > { %v377_v61 = vld [vmem:[%s1363_s4 + $0x8] sm:$0xff]  ;;  %v376_v62 = vld [vmem:[%s1363_s4] sm:$0xff]  ;;  %v379_v11 = vld [vmem:[%s1363_s4 + $0x18] sm:$0xff] }
  0x42   : > { %p943_p13 = pneg %p942_p12  ;;  %p949_p0 = por %p948_p10, %p947_p8 }
  0x43   : > { %275 = vadd.xlane.f32.xlu1 %v274_v16 }
  0x44   : > { %272 = vadd.xlane.f32.xlu0 %v271_v17  ;;  %v378_v17 = vld [vmem:[%s1363_s4 + $0x10] sm:$0xff]  ;;  %p950_p2 = pnand %p949_p0, %p943_p13 }
  0x47   : > { %281 = vadd.xlane.f32.xlu1 %v280_v22 }
  0x48   : > { %278 = vadd.xlane.f32.xlu0 %v277_v23 }
  0xc8   : > { %v267_v26 = vpop.xlane.xlu1 %266 }
  0xc9   : > { %v261_v27 = vpop.xlane.xlu0 %260  ;;  %v285_v32 = vmul.f32 0.00390625, %v267_v26 }
  0xca   : > { %v283_v30 = vmul.f32 0.00390625, %v261_v27  ;;  %v381_v27 = vld [vmem:[%s1363_s4 + $0x28] sm:$0xff] }
  0xcc   : > { %v270_v28 = vpop.xlane.xlu1 %269 }
  0xcd   : > { %v264_v29 = vpop.xlane.xlu0 %263  ;;  %v286_v33 = vmul.f32 0.00390625, %v270_v28 }
  0xce   : > { %v284_v31 = vmul.f32 0.00390625, %v264_v29  ;;  %v380_v29 = vld [vmem:[%s1363_s4 + $0x20] sm:$0xff] }
  0xcf   : > { %v814_v39 = vpack.c.bf16 %v286_v33, %v285_v32 }
  0xd0   : > { %v811_v34 = vpack.c.bf16 %v284_v31, %v283_v30  ;;  %v276_v35 = vpop.xlane.xlu1 %275 }
  0xd1   : > { %v273_v36 = vpop.xlane.xlu0 %272  ;;  %v288_v37 = vmul.f32 0.00390625, %v276_v35 }
  0xd2   : > { %812 = vmatpush3.bf16.msra.mxu0 %v811_v34  ;;  %v287_v38 = vmul.f32 0.00390625, %v273_v36  ;;  %v382_v36 = vld [vmem:[%s1363_s4 + $0x30] sm:$0xff] }
  0xd3   : > { %813 = vmatprep.subr.bf16.mxu0 %v1011_v24 }
  0xd4   : > { %v282_v40 = vpop.xlane.xlu1 %281  ;;  %v817_v42 = vpack.c.bf16 %v288_v37, %v287_v38 }
  0xd5   : > { %v279_v41 = vpop.xlane.xlu0 %278  ;;  %v290_v43 = vmul.f32 0.00390625, %v282_v40  ;;  %v383_v40 = vld [vmem:[%s1363_s4 + $0x38] sm:$0xff] }
  0xd6   : > { %815 = vmatpush3.bf16.msra.mxu0 %v814_v39  ;;  %v289_v44 = vmul.f32 0.00390625, %v279_v41 }
  0xd7   : > { %816 = vmatprep.subr.bf16.mxu0 %v1011_v24 }
  0xd8   : > { %v820_v45 = vpack.c.bf16 %v290_v43, %v289_v44 }
  0xda   : > { %818 = vmatpush3.bf16.msra.mxu0 %v817_v42 }
  0xdb   : > { %819 = vmatprep.subr.bf16.mxu0 %v1011_v24 }
  0xde   : > { %821 = vmatpush3.bf16.msra.mxu0 %v820_v45 }
  0xe1   : > { %794 = vmatmul.mubr.msk.f32.vlgmr.msra.gmra.mrb[0].mxu0 %vm293_vm1, %v291_v46 }
 0x1b4   : > { %v363_v49 = vpop.f32.mrb[0].mxu0 }
 0x1b5   : > { %v364_v50 = vadd.f32 %v363_v49, %v292_v48  ;;  %v795_v51 = vpop.f32.mrb[1].mxu0 }
 0x1b7   : > { %v367_v52 = vmax.f32 %v364_v50, 0.0 }
 0x1b9   : > { %796 = vmatprep.subr.msk.mxu1 %vm409_vm3, %v367_v52 }
 0x1ba   : > { %797 = vmatpush3.msk.msra.mxu1 %vm409_vm3, %v367_v52 }
 0x1bb   : > { %799 = vmatmul.mubr.msk.f32.vlgmr.msra.gmra.mrb[0].mxu1 %vm384_vm2, %v369_v53 }
 0x1bc   : > { %801 = vmatprep.mubr.msk.f32.mxu1 %vm384_vm2, %v370_v54 }
 0x1bf   : > { %802 = vmatmul.mubr.msk.f32.gmra.mrb[2].mxu1 %vm384_vm2, %v371_v55 }
 0x1c0   : > { %804 = vmatprep.mubr.msk.f32.mxu1 %vm384_vm2, %v372_v56 }
 0x1c3   : > { %805 = vmatmul.mubr.msk.f32.gmra.mrb[4].mxu1 %vm384_vm2, %v373_v57 }
 0x1c4   : > { %807 = vmatprep.mubr.msk.f32.mxu1 %vm384_vm2, %v374_v58 }
 0x1c7   : > { %808 = vmatmul.mubr.msk.f32.gmra.mrb[6].mxu1 %vm384_vm2, %v375_v59 }
 0x28e   : > { %v800_v63 = vpop.f32.mrb[0].mxu1 }
 0x28f   : > { %v485_v3 = vadd.f32 %v800_v63, %v377_v61  ;;  %v479_v7 = vpop.f32.mrb[1].mxu1 }
 0x290   : > { %v480_v10 = vadd.f32 %v479_v7, %v376_v62 }
 0x291   : > { %v745_v16 = vmul.f32 -1.442695, %v485_v3 }
 0x292   : > { %v744_v22 = vmul.f32 -1.442695, %v480_v10  ;;  %v803_v23 = vpop.f32.mrb[2].mxu1 }
 0x293   : > { %878 = vpow2.f32 %v745_v16  ;;  %v495_v24 = vadd.f32 %v803_v23, %v379_v11  ;;  %v489_v25 = vpop.f32.mrb[3].mxu1 }
 0x294   : > { %880 = vpow2.f32 %v744_v22  ;;  %v490_v26 = vadd.f32 %v489_v25, %v378_v17 }
 0x295   : > { %v747_v28 = vmul.f32 -1.442695, %v495_v24 }
 0x296   : > { %v746_v30 = vmul.f32 -1.442695, %v490_v26  ;;  %v806_v31 = vpop.f32.mrb[4].mxu1 }
 0x297   : > { %882 = vpow2.f32 %v747_v28  ;;  %v505_v32 = vadd.f32 %v806_v31, %v381_v27  ;;  %v499_v33 = vpop.f32.mrb[5].mxu1 }
 0x298   : > { %884 = vpow2.f32 %v746_v30  ;;  %v500_v34 = vadd.f32 %v499_v33, %v380_v29 }
 0x299   : > { %v749_v35 = vmul.f32 -1.442695, %v505_v32 }
 0x29a   : > { %v809_v37 = vpop.f32.mrb[6].mxu1  ;;  %v748_v38 = vmul.f32 -1.442695, %v500_v34 }
 0x29b   : > { %886 = vpow2.f32 %v749_v35  ;;  %v509_v39 = vpop.f32.mrb[7].mxu1  ;;  %v515_v47 = vadd.f32 %v809_v37, %v383_v40 }
 0x29c   : > { %v510_v41 = vadd.f32 %v509_v39, %v382_v36  ;;  %888 = vpow2.f32 %v748_v38 }
 0x29d   : > { %v879_v42 = vpop.eup %878  ;;  %v751_v51 = vmul.f32 -1.442695, %v515_v47 }
 0x29e   : > { %v881_v43 = vpop.eup %880  ;;  %v543_v44 = vadd.f32 1.0, %v879_v42  ;;  %v750_v45 = vmul.f32 -1.442695, %v510_v41 }
 0x29f   : > { %v542_v46 = vadd.f32 1.0, %v881_v43 }
 0x2a0   : > { %890 = vrcp.f32 %v543_v44 }
 0x2a1   : > { %v883_v48 = vpop.eup %882  ;;  %892 = vrcp.f32 %v542_v46 }
 0x2a2   : > { %v885_v49 = vpop.eup %884  ;;  %v545_v50 = vadd.f32 1.0, %v883_v48  ;;  %894 = vpow2.f32 %v750_v45 }
 0x2a3   : > { %v544_v52 = vadd.f32 1.0, %v885_v49 }
 0x2a4   : > { %896 = vrcp.f32 %v545_v50 }
 0x2a5   : > { %v887_v53 = vpop.eup %886  ;;  %898 = vpow2.f32 %v751_v51 }
 0x2a6   : > { %v547_v54 = vadd.f32 1.0, %v887_v53  ;;  %900 = vrcp.f32 %v544_v52  ;;  %v889_v55 = vpop.eup %888 }
 0x2a7   : > { %v546_v59 = vadd.f32 1.0, %v889_v55 }
 0x2a8   : > { %902 = vrcp.f32 %v547_v54 }
 0x2a9   : > { %904 = vrcp.f32 %v546_v59 }
 0x2aa   : > { %v891_v56 = vpop.eup %890 }
 0x2ab   : > { %v893_v57 = vpop.eup %892  ;;  %573 = vperm.xlu1 %877, %v891_v56  }
 0x2ac   : > { %v895_v58 = vpop.eup %894  ;;  %568 = vperm.xlu0 %876, %v893_v57  }
 0x2ad   : > { %v548_v61 = vadd.f32 1.0, %v895_v58 }
 0x2ae   : > { %v897_v60 = vpop.eup %896 }
 0x2af   : > { %583 = vperm.xlu1 %877, %v897_v60   ;;  %v899_v62 = vpop.eup %898  ;;  %906 = vrcp.f32 %v548_v61 }
 0x2b0   : > { %v901_v63 = vpop.eup %900  ;;  %v549_v7 = vadd.f32 1.0, %v899_v62 }
 0x2b2   : > { %v903_v3 = vpop.eup %902  ;;  %908 = vrcp.f32 %v549_v7 }
 0x2b3   : > { %578 = vperm.xlu1 %877, %v901_v63   ;;  %v905_v10 = vpop.eup %904 }
 0x2b7   : > { %593 = vperm.xlu1 %877, %v903_v3  }
 0x2b9   : > { %v907_v11 = vpop.eup %906 }
 0x2bb   : > { %588 = vperm.xlu1 %877, %v905_v10  }
 0x2bc   : > { %v909_v16 = vpop.eup %908 }
 0x2bf   : > { %598 = vperm.xlu1 %877, %v907_v11  }
 0x2c3   : > { %603 = vperm.xlu1 %877, %v909_v16  }
 0x32a   : > { %v574_v17 = vpop.permute.xlu1 %573 }
 0x32b   : > { %v608_v22 = vmul.f32 %v574_v17, %v1178_v8  ;;  %v609_v23 = vmul.f32 %v574_v17, %v1180_v9  ;;  %v569_v24 = vpop.permute.xlu0 %568 }
 0x32c   : > { %v606_v25 = vmul.f32 %v569_v24, %v1166_v2  ;;  %v607_v26 = vmul.f32 %v569_v24, %v1170_v4 }
 0x32d   : > { %624 = vst [vmem:[%s1278_s10 + $0x10] sm:$0xff] %v608_v22  ;;  %625 = vst [vmem:[%s1278_s10 + $0x18] sm:$0xff] %v609_v23 }
 0x32e   : > { %622 = vst [vmem:[%s1278_s10] sm:$0xff] %v606_v25  ;;  %623 = vst [vmem:[%s1278_s10 + $0x8] sm:$0xff] %v607_v26  ;;  %v584_v2 = vpop.permute.xlu1 %583 }
 0x32f   : > { %v612_v4 = vmul.f32 %v584_v2, %v1172_v5  ;;  %v613_v8 = vmul.f32 %v584_v2, %v1174_v6 }
 0x331   : > { %628 = vst [vmem:[%s1278_s10 + $0x30] sm:$0xff] %v612_v4  ;;  %629 = vst [vmem:[%s1278_s10 + $0x38] sm:$0xff] %v613_v8 }
 0x332   : > { %v579_v9 = vpop.permute.xlu1 %578 }
 0x333   : > { %v610_v27 = vmul.f32 %v579_v9, %v1162_v0  ;;  %v611_v28 = vmul.f32 %v579_v9, %v1164_v1 }
 0x335   : > { %626 = vst [vmem:[%s1278_s10 + $0x20] sm:$0xff] %v610_v27  ;;  %627 = vst [vmem:[%s1278_s10 + $0x28] sm:$0xff] %v611_v28 }
 0x336   : > { %v594_v29 = vpop.permute.xlu1 %593 }
 0x337   : > { %v616_v5 = vmul.f32 %v594_v29, %v1186_v12  ;;  %v617_v6 = vmul.f32 %v594_v29, %v1188_v13 }
 0x339   : > { %632 = vst [vmem:[%s1278_s10 + $0x50] sm:$0xff] %v616_v5  ;;  %633 = vst [vmem:[%s1278_s10 + $0x58] sm:$0xff] %v617_v6 }
 0x33a   : > { %v589_v30 = vpop.permute.xlu1 %588 }
 0x33b   : > { %v614_v31 = vmul.f32 %v589_v30, %v1190_v14  ;;  %v615_v0 = vmul.f32 %v589_v30, %v1192_v15 }
 0x33d   : > { %630 = vst [vmem:[%s1278_s10 + $0x40] sm:$0xff] %v614_v31  ;;  %631 = vst [vmem:[%s1278_s10 + $0x48] sm:$0xff] %v615_v0 }
 0x33e   : > { %v599_v1 = vpop.permute.xlu1 %598 }
 0x33f   : > { %v618_v32 = vmul.f32 %v599_v1, %v1202_v20  ;;  %v619_v12 = vmul.f32 %v599_v1, %v1204_v21 }
 0x341   : > { %634 = vst [vmem:[%s1278_s10 + $0x60] sm:$0xff] %v618_v32  ;;  %635 = vst [vmem:[%s1278_s10 + $0x68] sm:$0xff] %v619_v12 }
 0x342   : > { %v604_v13 = vpop.permute.xlu1 %603 }
 0x343   : > { %v620_v14 = vmul.f32 %v604_v13, %v1198_v18  ;;  %v621_v15 = vmul.f32 %v604_v13, %v1200_v19 }
 0x345   : > { %636 = vst [vmem:[%s1278_s10 + $0x70] sm:$0xff] %v620_v14  ;;  %637 = vst [vmem:[%s1278_s10 + $0x78] sm:$0xff] %v621_v15 }
 0x346   : > { %953 = shalt.err (!%p950_p2)
}
 0x347   : > { %s954_s15 = scalar_lea.hbm %s1309_s26, 2048  ;;  %s958_s7 = scalar_lea.hbm %s1364_s5, 4096 }
 0x348   : > { %p955_p4 = scmp.ne.s32.totalorder %s1309_s26, %s954_s15  ;;  %p959_p9 = scmp.lt.u32.totalorder %s1309_s26, %s1364_s5 }
 0x349   : > { %p960_p1 = scmp.lt.u32.totalorder %s958_s7, %s954_s15  ;;  %p962_p6 = scmp.lt.u32.totalorder %s954_s15, %s1309_s26 }
 0x34a   : > { %p956_p5 = pnand %p955_p4, %p1371_p11 }
 0x34b   : > { %p961_p3 = por %p960_p1, %p959_p9 }
 0x34c   : > { %p957_p7 = pneg %p956_p5 }
 0x34d   : > { %p963_p12 = por %p962_p6, %p961_p3 }
 0x34f   : > { %p964_p13 = pnand %p963_p12, %p957_p7 }
 0x351   : > { %967 = shalt.err (!%p964_p13)
}
 0x352   : > { %s1016_s25 = smov 256   ;;  %s1017_s13 = smov 16  }
 0x353   : > { %824 = dma.vmem_to_hbm [thread:$0]  (%p1371_p11), %s1311_s11, 2048, %s1309_s26, %s639_s22, %s1016_s25, %s1016_s25, %s1017_s13  }
 0x354 PF: > { %s667_s17 = sand.u32 1, %s994_s18   ;;  %p1372_p8 = scmp.ne.s32.totalorder %s1369_s6, 0 }
 0x355   : > { %p1373_p10 = scmp.ge.s32.totalorder %s1006_s21, 2  ;;  %s668_s28 = scalar_lea.sflag [#allocation4], %s667_s17 }
 0x357   : > { %p831_p0 = pnand %p1373_p10, %p1372_p8 }
 0x359   : > { %989 = dma.done.wait (!%p831_p0), %s668_s28, 2048  }
 0x35a   : > { %991 = vsyncadd (!%p831_p0), %s668_s28, 4294965248  ;;  %p18_p2 = scmp.ge.s32.totalorder %s1073_s24, 4   ;;  %s1374_s18 = smov %s998_s19 }
 0x35b   : > { %s1375_s19 = smov %s1002_s20  ;;  %s1376_s20 = smov %s1085_s27 }
 0x35c   : > { %s1377_s21 = smov %s1073_s24  ;;  %20 = sbr.rel (!%p18_p2) target bundleno = 5 (0x5), region = 85 }
 0x363   :  { %673 = vsyncpa [#allocation3], 1 }
 0x364   :  { %675 = vsyncpa [#allocation3 + $0x1], 1 }
 0x365   :  { %676 = vsyncpa [#allocation4], 1 }
 0x366   :  { %678 = vsyncpa [#allocation4 + $0x1], 1 }

</bundles_post_ra>
